<compile_context>
chip_gen: v7x
topology: tpu7x:2x2x1
jax: 0.10.0
libtpu: 0.0.40
codegen_flags: <defaults>
</compile_context>

<pallas_src>
import numpy as np
import jax
import jax.numpy as jnp
from jax.experimental import pallas as pl
from jax.experimental.pallas import tpu as pltpu

# ---- RealtimeSTFT config (small synthetic sizes, same constraints as the module) ----
BATCH = 16                        # >= 8 rows so the MXU/vreg sublanes are not mostly idle
TM = 8                            # rows per grid step (vreg sublane count)
N_FFT = 128                       # n_fft % 2 == 0
HOP = 32                          # (n_fft // 2) % hop == 0
IO_N_SAMPLES = 64                 # >= hop and % hop == 0
MODEL_IO_N_FRAMES = 8
EPS = 1e-8
LOG10_EPS = float(np.log10(EPS))
LN10 = float(np.log(10.0))
MAG_FLOOR = 1e-12                 # guards exact-zero / denormal bins only; |X|>=1e-12 == torch

IO_N_FRAMES = IO_N_SAMPLES // HOP                          # 2
OVERLAP_N_FRAMES = N_FFT // 2 // HOP                       # 2
IN_BUF_N_FRAMES = 2 * OVERLAP_N_FRAMES + IO_N_FRAMES - 1   # 5
N_BINS = N_FFT // 2 + 1                                    # 65 real bins
N_PAD = 128                                                # bins zero-padded to one lane tile
ISTFT_IN_N_FRAMES = IO_N_FRAMES                            # center=False
ISTFT_LENGTH = IN_BUF_N_FRAMES * HOP                       # 160 == n_fft + hop*(T-1)
FADE_N_SAMPLES = 0
OUT_BUF_N_SAMPLES = IO_N_SAMPLES + FADE_N_SAMPLES          # 64
RI_HALF = IO_N_FRAMES * N_PAD                              # 256: [t0|t1] per re/im half
N_OUT_PAD = 128                                            # lane-dense output (64 real + 64 zero)
FWD_ROWS = IO_N_SAMPLES + 8                                # 64 audio rows + 8-row bias block

# With model=None the log10/ensure_pos/10** round-trip is exactly max(|X|, eps); keep the
# explicit log path available for a future model != None.
APPLY_LOG_ROUNDTRIP = False

assert N_FFT % 2 == 0 and (N_FFT // 2) % HOP == 0
assert IO_N_SAMPLES >= HOP and IO_N_SAMPLES % HOP == 0
assert IO_N_FRAMES <= MODEL_IO_N_FRAMES and ISTFT_IN_N_FRAMES <= MODEL_IO_N_FRAMES
assert OUT_BUF_N_SAMPLES <= ISTFT_LENGTH
assert BATCH % TM == 0 and TM % 8 == 0


# ------------------------------- the single fused kernel -------------------------------
def _rt_stft_fused_kernel(audio_ref, fwdp_ref, inv_ref, out_ref):
    # analysis: in_buf framing + hann window + real DFT folded into the fwd rows; the constant
    # eps-prefix contribution rides along as the packed bias row (one MXU pass + one VPU add).
    fwd = fwdp_ref[:IO_N_SAMPLES, :]                               # (64, 512) bf16
    bias = fwdp_ref[IO_N_SAMPLES:IO_N_SAMPLES + 1, :].astype(jnp.float32)   # (1, 512)
    spec = jnp.dot(audio_ref[...].astype(jnp.bfloat16), fwd,
                   preferred_element_type=jnp.float32) + bias      # (TM, 512) f32

    # Elementwise chain on the 256 UNIQUE lanes only (Re/Im split at the 128-aligned boundary).
    re = spec[:, :RI_HALF]
    im = spec[:, RI_HALF:]
    mag = jnp.sqrt(re * re + im * im)                              # (TM, 256) == |X|
    if APPLY_LOG_ROUNDTRIP:
        # _logarithmize_spec + ensure_pos_spec, then spec_to_audio's add-back + _unlogarithmize
        logmag = jnp.log(jnp.maximum(mag, EPS)) * (1.0 / LN10) - LOG10_EPS
        mag2 = jnp.maximum(jnp.exp((logmag + LOG10_EPS) * LN10), EPS)
    else:
        # model=None: the round-trip is algebraically max(|X|, eps)
        mag2 = jnp.maximum(mag, EPS)
    # torch.polar(mag2, torch.angle(X)) == (mag2 / |X|) * X  -- no atan2 / sin / cos needed.
    scale = mag2 * pl.reciprocal(jnp.maximum(mag, MAG_FLOOR), approx=False)
    spec_scaled = jnp.concatenate([re * scale, im * scale], axis=1).astype(jnp.bfloat16)

    # synthesis: inverse rDFT + synthesis window + overlap-add + 1/envelope + tail crop, all
    # folded into the (lane-dense, 128-wide) inv table (one MXU pass) -> (TM, 128)
    out_ref[...] = jnp.dot(spec_scaled, inv_ref[...], preferred_element_type=jnp.float32)


def realtime_stft_forward(audio, fwd_packed, inv_mat, spec_wetdry_ratio=1.0):
    # model=None and spec_diff_mode=False: wet_spec == dry_spec, so the wet/dry mix is the
    # identity and only the freshly computed io_n_frames reach the iSTFT -- the mag/phase
    # model-IO ring buffers are elided algebraically.
    del spec_wetdry_ratio
    B = audio.shape[0]
    assert B % TM == 0
    grid = (B // TM,)

    cost = pl.CostEstimate(
        flops=B * (2 * IO_N_SAMPLES * 2 * RI_HALF + 2 * (2 * RI_HALF) * N_OUT_PAD),
        transcendentals=B * 2 * RI_HALF,                 # sqrt + reciprocal per unique lane
        bytes_accessed=(fwd_packed.size * 2 + inv_mat.size * 2
                        + B * IO_N_SAMPLES * 4 + B * N_OUT_PAD * 4),
    )

    out_padded = pl.pallas_call(
        _rt_stft_fused_kernel,
        out_shape=jax.ShapeDtypeStruct((B, N_OUT_PAD), jnp.float32),
        grid_spec=pltpu.PrefetchScalarGridSpec(
            num_scalar_prefetch=0,
            grid=grid,
            in_specs=[
                pl.BlockSpec((TM, IO_N_SAMPLES), lambda i: (i, 0)),        # per-tile audio rows
                pl.BlockSpec((FWD_ROWS, 2 * RI_HALF), lambda i: (0, 0)),   # grid-invariant table
                pl.BlockSpec((2 * RI_HALF, N_OUT_PAD), lambda i: (0, 0)),  # grid-invariant table
            ],
            out_specs=pl.BlockSpec((TM, N_OUT_PAD), lambda i: (i, 0)),
        ),
        compiler_params=pltpu.CompilerParams(dimension_semantics=("parallel",)),
        cost_estimate=cost,
    )(audio, fwd_packed, inv_mat)
    # crop the 64 zero padding lanes added for a lane-dense store
    return out_padded[:, :OUT_BUF_N_SAMPLES]


# ----------------- deterministic table construction (float64 -> bfloat16) -----------------
def make_tables():
    n = np.arange(N_FFT)
    # torch.hann_window(n_fft) (periodic), clamped at 1e-5 because center=False
    window = np.clip(0.5 - 0.5 * np.cos(2.0 * np.pi * n / N_FFT), 1e-5, None)

    k = np.arange(N_PAD)
    real_bin = (k < N_BINS).astype(np.float64)              # zero the padded bins 65..127

    # forward rDFT (torch.stft, onesided, normalized=False) with analysis window folded in:
    #   Re_t[k] =  sum_n frame_t[n] * w[n] * cos(2*pi*k*n/N)
    #   Im_t[k] = -sum_n frame_t[n] * w[n] * sin(2*pi*k*n/N)
    ang = 2.0 * np.pi * np.outer(n, k) / N_FFT               # (n_fft, n_pad)
    c_mat = np.cos(ang) * window[:, None] * real_bin[None, :]
    s_mat = -np.sin(ang) * window[:, None] * real_bin[None, :]

    # in_buf after reset()+roll+write == [eps]*prefix ++ audio ; frame_t[n] = in_buf[t*hop + n].
    # Fold the framing into fwd (audio part) + bias (constant eps-prefix part).
    # Column layout: [t0_re | t1_re | t0_im | t1_im], each block N_PAD wide.
    prefix = IN_BUF_N_FRAMES * HOP - IO_N_SAMPLES             # 96
    fwd = np.zeros((IO_N_SAMPLES, 2 * RI_HALF))
    bias = np.zeros((2 * RI_HALF,))
    for t in range(IO_N_FRAMES):
        off = prefix - t * HOP                                # eps samples at head of frame t
        m_len = N_FFT - off                                   # audio samples in frame t
        re_cols = slice(t * N_PAD, (t + 1) * N_PAD)
        im_cols = slice(RI_HALF + t * N_PAD, RI_HALF + (t + 1) * N_PAD)
        fwd[:m_len, re_cols] = c_mat[off:, :]
        fwd[:m_len, im_cols] = s_mat[off:, :]
        bias[re_cols] = EPS * c_mat[:off, :].sum(axis=0)
        bias[im_cols] = EPS * s_mat[:off, :].sum(axis=0)

    # Pack fwd + bias into a single (8-row-padded) table -> one input / one DMA.
    fwd_packed = np.zeros((FWD_ROWS, 2 * RI_HALF))
    fwd_packed[:IO_N_SAMPLES, :] = fwd
    fwd_packed[IO_N_SAMPLES, :] = bias                        # rows 65..71 stay zero (padding)

    # inverse rDFT (torch.istft, normalized=False): x[n] = (1/N) sum_k c_k (Re cos - Im sin),
    # c_k = 2 except DC/Nyquist; synthesis window, OLA, 1/env and tail crop folded in.
    ck = np.full((N_PAD,), 2.0)
    ck[0] = 1.0
    ck[N_FFT // 2] = 1.0
    ck = ck * real_bin
    iang = 2.0 * np.pi * np.outer(k, n) / N_FFT               # (n_pad, n_fft)
    icos = (ck[:, None] / N_FFT) * np.cos(iang)
    isin = -(ck[:, None] / N_FFT) * np.sin(iang)

    tail0 = ISTFT_LENGTH - OUT_BUF_N_SAMPLES                  # 96: first returned sample
    env = np.zeros((OUT_BUF_N_SAMPLES,))
    for s in range(OUT_BUF_N_SAMPLES):
        for t in range(IO_N_FRAMES):
            nn = tail0 + s - t * HOP
            if 0 <= nn < N_FFT:
                env[s] += window[nn] ** 2
    inv_env = 1.0 / env                                       # precomputed on host

    # Lane-dense inv table: real samples in columns 0..63, zero padding in 64..127.
    inv = np.zeros((2 * RI_HALF, N_OUT_PAD))
    for s in range(OUT_BUF_N_SAMPLES):
        for t in range(IO_N_FRAMES):
            nn = tail0 + s - t * HOP
            if 0 <= nn < N_FFT:
                wfac = window[nn] * inv_env[s]
                inv[t * N_PAD:(t + 1) * N_PAD, s] += icos[:, nn] * wfac
                inv[RI_HALF + t * N_PAD:RI_HALF + (t + 1) * N_PAD, s] += isin[:, nn] * wfac

    # bf16 tables: the MXU consumes bf16 operands anyway (f32 at DEFAULT precision is truncated);
    # this halves table HBM->VMEM traffic.  Accumulation stays f32 in-kernel.
    return (jnp.asarray(fwd_packed, dtype=jnp.bfloat16),
            jnp.asarray(inv, dtype=jnp.bfloat16))


if __name__ == "__main__":
    fwd_packed, inv_mat = make_tables()
    key = jax.random.PRNGKey(0)
    audio = jax.random.normal(key, (BATCH, IO_N_SAMPLES), dtype=jnp.float32)

    fwd_fn = jax.jit(realtime_stft_forward)
    out = jax.block_until_ready(fwd_fn(audio, fwd_packed, inv_mat))

    assert out.shape == (BATCH, IO_N_SAMPLES), out.shape
    assert bool(jnp.all(jnp.isfinite(out)))
    # With model=None, RealtimeSTFT is (numerically) an identity on the hop-aligned stream.
    # Check the output samples whose OLA window-envelope is well conditioned (the first 32);
    # the last samples are divided by window values down to ~6e-4 exactly as torch.istft does,
    # so those are covered by the finiteness check only.
    n_check = N_FFT - (ISTFT_LENGTH - OUT_BUF_N_SAMPLES)      # 32
    err = float(jnp.max(jnp.abs(out[:, :n_check] - audio[:, :n_check])))
    assert err < 5e-2, err
    print("KERNEL_OK")
</pallas_src>

<mosaic_0001>
module attributes {stable_mosaic.version = 11 : i64} {
  func.func @_rt_stft_fused_kernel(%arg0: i32, %arg1: memref<8x64xf32, #tpu.memory_space<vmem>>, %arg2: memref<72x512xbf16, #tpu.memory_space<vmem>>, %arg3: memref<512x128xbf16, #tpu.memory_space<vmem>>, %arg4: memref<8x128xf32, #tpu.memory_space<vmem>>) attributes {dimension_semantics = [#tpu.dimension_semantics<parallel>], iteration_bounds = array<i64: 2>, scalar_prefetch = 0 : i64, scratch_operands = 0 : i64, tpu.core_type = #tpu.core_type<tc>, window_params = [{transform_indices = @transform_0, window_bounds = array<i64: 8, 64>}, {pipeline_mode = #tpu.pipeline_mode<synchronous>, transform_indices = @transform_1, window_bounds = array<i64: 72, 512>}, {pipeline_mode = #tpu.pipeline_mode<synchronous>, transform_indices = @transform_2, window_bounds = array<i64: 512, 128>}, {transform_indices = @transform_3, window_bounds = array<i64: 8, 128>}]} {
    %c0 = arith.constant 0 : index
    %c0_0 = arith.constant 0 : index
    %0 = vector.load %arg2[%c0, %c0_0] : memref<72x512xbf16, #tpu.memory_space<vmem>>, vector<64x512xbf16>
    %c64 = arith.constant 64 : index
    %c0_1 = arith.constant 0 : index
    %1 = vector.load %arg2[%c64, %c0_1] : memref<72x512xbf16, #tpu.memory_space<vmem>>, vector<1x512xbf16>
    %2 = arith.extf %1 : vector<1x512xbf16> to vector<1x512xf32>
    %c0_2 = arith.constant 0 : index
    %c0_3 = arith.constant 0 : index
    %3 = vector.load %arg1[%c0_2, %c0_3] : memref<8x64xf32, #tpu.memory_space<vmem>>, vector<8x64xf32>
    %4 = arith.truncf %3 : vector<8x64xf32> to vector<8x64xbf16>
    %cst = arith.constant dense<0.000000e+00> : vector<8x512xf32>
    %5 = tpu.matmul %4, %0, %cst {dimension_numbers = #tpu.dot_dimension_numbers<[1], [0], [0], [1], [0, 0, 1, 1], [], []>} : vector<8x64xbf16>, vector<64x512xbf16>, vector<8x512xf32> -> vector<8x512xf32>
    %6 = vector.broadcast %2 : vector<1x512xf32> to vector<8x512xf32>
    %7 = arith.addf %5, %6 : vector<8x512xf32>
    %8 = vector.extract_strided_slice %7 {offsets = [0, 0], sizes = [8, 256], strides = [1, 1]} : vector<8x512xf32> to vector<8x256xf32>
    %9 = vector.extract_strided_slice %7 {offsets = [0, 256], sizes = [8, 256], strides = [1, 1]} : vector<8x512xf32> to vector<8x256xf32>
    %10 = arith.mulf %8, %8 : vector<8x256xf32>
    %11 = arith.mulf %9, %9 : vector<8x256xf32>
    %12 = arith.addf %10, %11 : vector<8x256xf32>
    %13 = math.sqrt %12 : vector<8x256xf32>
    %cst_4 = arith.constant 9.99999993E-9 : f32
    %14 = vector.broadcast %cst_4 : f32 to vector<8x256xf32>
    %15 = arith.maximumf %13, %14 : vector<8x256xf32>
    %cst_5 = arith.constant 9.99999996E-13 : f32
    %16 = vector.broadcast %cst_5 : f32 to vector<8x256xf32>
    %17 = arith.maximumf %13, %16 : vector<8x256xf32>
    %18 = tpu.reciprocal %17 : vector<8x256xf32> -> vector<8x256xf32>
    %19 = arith.mulf %15, %18 : vector<8x256xf32>
    %20 = arith.mulf %8, %19 : vector<8x256xf32>
    %21 = arith.mulf %9, %19 : vector<8x256xf32>
    %22 = tpu.concatenate %20, %21 in 1 : vector<8x256xf32>, vector<8x256xf32> -> vector<8x512xf32>
    %23 = arith.truncf %22 : vector<8x512xf32> to vector<8x512xbf16>
    %c0_6 = arith.constant 0 : index
    %c0_7 = arith.constant 0 : index
    %24 = vector.load %arg3[%c0_6, %c0_7] : memref<512x128xbf16, #tpu.memory_space<vmem>>, vector<512x128xbf16>
    %cst_8 = arith.constant dense<0.000000e+00> : vector<8x128xf32>
    %25 = tpu.matmul %23, %24, %cst_8 {dimension_numbers = #tpu.dot_dimension_numbers<[1], [0], [0], [1], [0, 0, 1, 1], [], []>} : vector<8x512xbf16>, vector<512x128xbf16>, vector<8x128xf32> -> vector<8x128xf32>
    %c0_9 = arith.constant 0 : index
    %c0_10 = arith.constant 0 : index
    %26 = vector.load %arg4[%c0_9, %c0_10] : memref<8x128xf32, #tpu.memory_space<vmem>>, vector<8x128xf32>
    tpu.vector_store %arg4[%c0_9, %c0_10], %25 {strides = array<i32>} : memref<8x128xf32, #tpu.memory_space<vmem>>, vector<8x128xf32>,
    return
  }
  func.func @transform_0(%arg0: i32) -> (i32, i32) {
    %c0_i32 = arith.constant 0 : i32
    %c0_i32_0 = arith.constant 0 : i32
    return %arg0, %c0_i32 : i32, i32
  }
  func.func @transform_1(%arg0: i32) -> (i32, i32) {
    %c0_i32 = arith.constant 0 : i32
    %c0_i32_0 = arith.constant 0 : i32
    %c0_i32_1 = arith.constant 0 : i32
    return %c0_i32, %c0_i32_0 : i32, i32
  }
  func.func @transform_2(%arg0: i32) -> (i32, i32) {
    %c0_i32 = arith.constant 0 : i32
    %c0_i32_0 = arith.constant 0 : i32
    %c0_i32_1 = arith.constant 0 : i32
    return %c0_i32, %c0_i32_0 : i32, i32
  }
  func.func @transform_3(%arg0: i32) -> (i32, i32) {
    %c0_i32 = arith.constant 0 : i32
    %c0_i32_0 = arith.constant 0 : i32
    return %arg0, %c0_i32 : i32, i32
  }
}

</mosaic_0001>

<bundles_post_ra>
// kernel: realtime_stft_forward.1
= control target key start
LH: loop header
LB: loop body
LE: loop exit
PB: predicated region body
PF: predicated region fallthrough
CT: control target
= control target key end

     0   :  { %8 = vsyncpa [#allocation3], 0  ;;  %s1567_s0 = inlined_call_operand.hbm [shape: f32[16,64], index: 0, kind: input, shape index: {}]   ;;  %s1568_s1 = inlined_call_operand.hbm [shape: bf16[72,512], index: 1, kind: input, shape index: {}]   ;;  %s1569_s2 = inlined_call_operand.hbm [shape: bf16[512,128], index: 2, kind: input, shape index: {}]   ;;  %s1570_s3 = inlined_call_operand.hbm [shape: f32[16,128], index: 3, kind: output, shape index: {}]  }
   0x1   :  { %10 = vsyncpa [#allocation3 + $0x1], 0 }
   0x2   :  { %11 = vsyncpa [#allocation6], 0 }
   0x3   :  { %12 = vsyncpa [#allocation4], 0 }
   0x4   :  { %14 = vsyncpa [#allocation4 + $0x1], 0  ;;  %s1331_s12 = smov 0   ;;  %s1333_s13 = smov 0  }
   0x5   :  { %s1335_s14 = smov 0   ;;  %s1337_s15 = smov 0  }
   0x6 LB: > { %s1352_s16 = sadd.s32 4294967295, %s1300_s15   ;;  %s898_s17 = sadd.s32 4294967294, %s1300_s15   ;;  %s1300_s15 = sphi %s1337_s15, %s1590_s15   ;;  %s1296_s14 = sphi %s1335_s14, %s1589_s14   ;;  %s1292_s13 = sphi %s1333_s13, %s1588_s13   ;;  %s1288_s12 = sphi %s1331_s12, %s1587_s12  }
   0x7   : > { %p40_p0 = scmp.ne.s32.totalorder %s1292_s13, %s1288_s12  ;;  %p1571_p1 = scmp.eq.s32.totalorder %s1352_s16, 0 }
   0x8   : > { %p112_p3 = scmp.eq.s32.totalorder %s898_s17, 1  ;;  %p899_p5 = scmp.ge.s32.totalorder %s1300_s15, 1 }
   0x9   : > { %p1361_p4 = por %p1571_p1, %p40_p0  ;;  %p119_p7 = scmp.lt.s32.totalorder %s1300_s15, 3 }
   0xa   : > { %p1366_p6 = por %p112_p3, %p40_p0  ;;  %s1302_s21 = smov [#allocation5]  }
   0xb   : > { %s1574_s18 = scalar_select %p1361_p4, 1, 0 }
   0xc   : > { %s1575_s19 = scalar_select %p1366_p6, 1, 0 }
   0xd   : > { %p1371_p8 = pnand %p899_p5, %p119_p7  ;;  %s131_s22 = sshll.u32 %s1302_s21, 4  ;;  %s1375_s22 = int_to_ptr.vmem [resolvable:$true] %s131_s22 }
   0xe   : > { %s1303_s24 = smov [#allocation7]   ;;  %s1144_s28 = scalar_lea.hbm %s1568_s1, 2304 }
   0xf   : > { %p1020_p9 = pneg %p1371_p8  ;;  %s144_s25 = sshll.u32 %s1303_s24, 4  ;;  %s1386_s25 = int_to_ptr.vmem [resolvable:$true] %s144_s25 }
  0x10   : > { %p1145_p12 = scmp.ne.s32.totalorder %s1568_s1, %s1144_s28  ;;  %p1151_p5 = scmp.lt.u32.totalorder %s1144_s28, %s1568_s1 }
  0x11   : > { %p1382_p11 = pnand %p1020_p9, %p1571_p1 }
  0x13   : > { %p1146_p13 = pneg %p1382_p11 }
  0x15   : > { %p1147_p0 = pnand %p1146_p13, %p1145_p12 }
  0x17   : > { %p1148_p3 = pneg %p1147_p0 }
  0x19   : > { %p1153_p7 = pnand %p1151_p5, %p1148_p3 }
  0x1b   : > { %1156 = shalt.err (!%p1153_p7)
}
  0x1c   : > { %s1157_s6 = scalar_lea.vmem %s1375_s22, 2304  ;;  %p1165_p2 = scmp.lt.s32.totalorder %s1375_s22, %s1375_s22 }
  0x1d   : > { %p1158_p9 = scmp.ne.s32.totalorder %s1375_s22, %s1157_s6  ;;  %p1166_p12 = scmp.lt.s32.totalorder %s1157_s6, %s1157_s6 }
  0x1f   : > { %p1160_p10 = pnand %p1158_p9, %p1146_p13  ;;  %p1167_p0 = por %p1166_p12, %p1165_p2 }
  0x21   : > { %p1161_p1 = pneg %p1160_p10 }
  0x23   : > { %p1168_p6 = pnand %p1167_p0, %p1161_p1 }
  0x25   : > { %1171 = shalt.err (!%p1168_p6)
}
  0x26   : > { %s1304_s7 = smov 256   ;;  %s1305_s8 = smov 16  }
  0x27   : > { %1023 = dma.hbm_to_vmem [thread:$0]  (!%p1382_p11), %s1568_s1, 2304, %s1375_s22, [#allocation6], %s1304_s7, %s1304_s7, %s1305_s8  }
  0x28   : > { %s1172_s21 = scalar_lea.hbm %s1569_s2, 4096 }
  0x29   : > { %p1173_p2 = scmp.ne.s32.totalorder %s1569_s2, %s1172_s21  ;;  %p1179_p10 = scmp.lt.u32.totalorder %s1172_s21, %s1569_s2 }
  0x2b   : > { %p1175_p1 = pnand %p1173_p2, %p1146_p13 }
  0x2d   : > { %p1176_p6 = pneg %p1175_p1 }
  0x2f   : > { %p1181_p3 = pnand %p1179_p10, %p1176_p6 }
  0x31   : > { %1184 = shalt.err (!%p1181_p3)
}
  0x32   : > { %s1185_s22 = scalar_lea.vmem %s1386_s25, 4096  ;;  %p1193_p12 = scmp.lt.s32.totalorder %s1386_s25, %s1386_s25 }
  0x33   : > { %p1186_p5 = scmp.ne.s32.totalorder %s1386_s25, %s1185_s22  ;;  %p1194_p0 = scmp.lt.s32.totalorder %s1185_s22, %s1185_s22 }
  0x35   : > { %p1188_p7 = pnand %p1186_p5, %p1146_p13  ;;  %p1195_p2 = por %p1194_p0, %p1193_p12 }
  0x37   : > { %p1189_p9 = pneg %p1188_p7 }
  0x39   : > { %p1196_p1 = pnand %p1195_p2, %p1189_p9 }
  0x3b   : > { %1199 = shalt.err (!%p1196_p1)
}
  0x3c   : > { %s1306_s29 = smov 64   ;;  %s1307_s30 = smov 4  }
  0x3d   : > { %1026 = dma.hbm_to_vmem [thread:$0]  (!%p1382_p11), %s1569_s2, 4096, %s1386_s25, [#allocation6], %s1306_s29, %s1306_s29, %s1307_s30  }
  0x3e   : > { %s1441_s6 = sadd.s32 1, %s1300_s15   ;;  %s27_s8 = sadd.s32 1, %s1296_s14 }
  0x3f   : > { %s24_s7 = ssub.s32 %s1300_s15, %s1441_s6  ;;  %p34_p6 = scmp.ne.s32.totalorder %s1296_s14, %s1292_s13 }
  0x40   : > { %p25_p13 = scmp.eq.s32.totalorder %s24_s7, 0  ;;  %p35_p10 = scmp.eq.s32.totalorder %s1300_s15, 0 }
  0x41   : > { %p1578_p5 = scmp.eq.s32.totalorder %s1352_s16, 1  ;;  %p1037_p9 = scmp.lt.s32.totalorder %s1300_s15, 2 }
  0x42   : > { %s1450_s9 = scalar_select %p25_p13, %s1296_s14, %s27_s8  }
  0x43   : > { %p36_p3 = por %p35_p10, %p34_p6  ;;  %p1454_p7 = por %p1578_p5, %p34_p6 }
  0x44   : > { %s158_s23 = sand.u32 1, %s1296_s14   ;;  %s904_s25 = sshll.u32 %s1300_s15, 7 }
  0x45   : > { %s1579_s10 = scalar_select %p1454_p7, 1, 0 }
  0x46   : > { %s903_s11 = sshll.u32 %s158_s23, 3  ;;  %s1464_s24 = scalar_lea.hbm %s1567_s0, %s904_s25 }
  0x47   : > { %s162_s26 = scalar_lea.vmem [#allocation2], %s903_s11  ;;  %p1468_p11 = pnand %p1037_p9, %p36_p3 }
  0x48   : > { %s169_s27 = sshll.u32 %s162_s26, 4  ;;  %s159_s22 = scalar_lea.sflag [#allocation3], %s158_s23  ;;  %s1466_s27 = int_to_ptr.vmem [resolvable:$true] %s169_s27 }
  0x49   : > { %s1200_s29 = scalar_lea.hbm %s1464_s24, 128  ;;  %p1202_p0 = pneg %p1468_p11 }
  0x4a   : > { %p1201_p12 = scmp.ne.s32.totalorder %s1464_s24, %s1200_s29  ;;  %s1205_s5 = scalar_lea.hbm %s1567_s0, 256 }
  0x4b   : > { %p1206_p13 = scmp.lt.u32.totalorder %s1464_s24, %s1567_s0  ;;  %p1207_p6 = scmp.lt.u32.totalorder %s1205_s5, %s1200_s29 }
  0x4c   : > { %p1203_p2 = pnand %p1202_p0, %p1201_p12  ;;  %p1209_p3 = scmp.lt.u32.totalorder %s1200_s29, %s1464_s24 }
  0x4d   : > { %p1208_p10 = por %p1207_p6, %p1206_p13 }
  0x4e   : > { %p1204_p1 = pneg %p1203_p2 }
  0x4f   : > { %p1210_p5 = por %p1209_p3, %p1208_p10 }
  0x51   : > { %p1211_p9 = pnand %p1210_p5, %p1204_p1 }
  0x53   : > { %1214 = shalt.err (!%p1211_p9)
}
  0x54   : > { %s1215_s23 = scalar_lea.vmem %s1466_s27, 128  ;;  %s1308_s11 = smov [#allocation2]  }
  0x55   : > { %p1216_p12 = scmp.ne.s32.totalorder %s1466_s27, %s1215_s23  ;;  %s1220_s25 = sshll.u32 %s1308_s11, 4  ;;  %s1221_s25 = int_to_ptr.vmem [resolvable:$false] %s1220_s25 }
  0x56   : > { %s1222_s17 = scalar_lea.vmem %s1221_s25, 256  ;;  %p1223_p4 = scmp.lt.s32.totalorder %s1466_s27, %s1221_s25 }
  0x57   : > { %p1218_p2 = pnand %p1216_p12, %p1202_p0  ;;  %p1224_p13 = scmp.lt.s32.totalorder %s1222_s17, %s1215_s23 }
  0x59   : > { %p1219_p7 = pneg %p1218_p2  ;;  %p1225_p6 = por %p1224_p13, %p1223_p4 }
  0x5b   : > { %p1226_p10 = pnand %p1225_p6, %p1219_p7 }
  0x5d   : > { %1229 = shalt.err (!%p1226_p10)
}
  0x5e   : > { %1030 = dma.hbm_to_vmem [thread:$0]  (!%p1468_p11), %s1464_s24, 128, %s1466_s27, %s159_s22  }
  0x5f   : > { %178 = sbr.rel (%p1371_p8) target bundleno = 609 (0x261), region = 32  ;;  %s1500_s21 = sand.u32 (!%p1371_p8), 1, %s1292_s13  }
  0x60   : > { %s906_s26 = sshll.u32 (!%p1371_p8), %s1500_s21, 3  ;;  %s181_s29 = scalar_lea.sflag (!%p1371_p8), [#allocation3], %s1500_s21 }
  0x61   : > { %s1506_s30 = scalar_lea.vmem (!%p1371_p8), [#allocation2], %s906_s26  ;;  %p1581_p4 = scmp.ne.s32.totalorder (!%p1371_p8), %s1574_s18, 0 }
  0x66   : > { %1275 = dma.done.wait (%p1581_p4), %s181_s29, 128  }
  0x67   : > { %1277 = vsyncadd (%p1581_p4), %s181_s29, 4294967168  ;;  %p1582_p7 = scmp.eq.s32.totalorder %s1352_s16, 0 }
  0x69   : > { %1279 = dma.done.wait (%p1582_p7), [#allocation6], 6400   ;;  %p1583_p8 = pmov %p1582_p7 }
  0x6a   : > { %v1309_v0 = vmov 0   ;;  %v1080_v1 = vld [vmem:[#allocation5 + $0x4] ss:$16 sps:$4 sm:$0xff]   ;;  %v1082_v2 = vld [vmem:[#allocation5 + $0xc] ss:$16 sps:$4 sm:$0xff]   ;;  %vm336_vm0 = vcmask 523264   ;;  %v240_v51 = vlaneseq }
  0x6b   : > { %1281 = vsyncadd (%p1583_p8), [#allocation6], 4294960896  ;;  %372 = vmatprep.mubr.bf16.mxu0 %v1309_v0  ;;  %413 = vmatprep.mubr.bf16.mxu1 %v1309_v0  ;;  %v1084_v3 = vld [vmem:[#allocation5] ss:$16 sps:$4 sm:$0xff]   ;;  %v1085_v4 = vld [vmem:[#allocation5 + $0x8] ss:$16 sps:$4 sm:$0xff]  }
  0x6c   : > { %340 = vmatprep.subr.bf16.mxu0 %v1080_v1  ;;  %381 = vmatprep.subr.bf16.mxu1 %v1082_v2  ;;  %v1086_v5 = vld [vmem:[#allocation5 + $0x24] ss:$16 sps:$4 sm:$0xff]   ;;  %v1088_v6 = vld [vmem:[#allocation5 + $0x2c] ss:$16 sps:$4 sm:$0xff]   ;;  %v1090_v7 = vld [vmem:[#allocation5 + $0x20] ss:$16 sps:$4 sm:$0xff]  }
  0x6d   : > { %341 = vmatpush1.bf16.msra.mxu0 %v1084_v3  ;;  %382 = vmatpush1.bf16.msra.mxu1 %v1085_v4  ;;  %v1091_v8 = vld [vmem:[#allocation5 + $0x28] ss:$16 sps:$4 sm:$0xff]   ;;  %v1092_v9 = vld [vmem:[#allocation5 + $0x44] ss:$16 sps:$4 sm:$0xff]   ;;  %v1094_v10 = vld [vmem:[#allocation5 + $0x4c] ss:$16 sps:$4 sm:$0xff]  }
  0x6e   : > { %342 = vmatprep.subr.bf16.mxu0 %v1086_v5  ;;  %383 = vmatprep.subr.bf16.mxu1 %v1088_v6  ;;  %v1096_v11 = vld [vmem:[#allocation5 + $0x40] ss:$16 sps:$4 sm:$0xff]   ;;  %v1097_v12 = vld [vmem:[#allocation5 + $0x48] ss:$16 sps:$4 sm:$0xff]   ;;  %v1098_v13 = vld [vmem:[#allocation5 + $0x64] ss:$16 sps:$4 sm:$0xff]  }
  0x6f   : > { %v1100_v14 = vld [vmem:[#allocation5 + $0x6c] ss:$16 sps:$4 sm:$0xff]   ;;  %v1102_v15 = vld [vmem:[#allocation5 + $0x60] ss:$16 sps:$4 sm:$0xff]   ;;  %v1103_v16 = vld [vmem:[#allocation5 + $0x68] ss:$16 sps:$4 sm:$0xff]  }
  0x70   : > { %v238_v17 = vld [vmem:[%s1506_s30] sm:$0xff]  ;;  %v1112_v27 = vld [vmem:[#allocation7 + $0x50] sm:$0xff]   ;;  %v1116_v31 = vld [vmem:[#allocation7 + $0x58] sm:$0xff]   ;;  %v241_v52 = vshrl.u32 %v240_v51, 7  ;;  %s961_s18 = sshll.u32 %s1352_s16, 7  ;;  %s214_s20 = scalar_lea.vmem [#allocation8], %s906_s26 }
  0x71   : > { %343 = vmatpush1.bf16.msra.mxu0 %v1090_v7  ;;  %384 = vmatpush1.bf16.msra.mxu1 %v1091_v8  ;;  %v239_v18 = vpack.c.bf16 %v238_v17, %v238_v17  ;;  %v1104_v19 = vld [vmem:[#allocation7 + $0x40] sm:$0xff]   ;;  %v1108_v23 = vld [vmem:[#allocation7 + $0x48] sm:$0xff]   ;;  %v1113_v28 = vld [vmem:[#allocation7 + $0xd0] sm:$0xff]   ;;  %s809_s24 = sshll.u32 %s214_s20, 4  ;;  %s1523_s22 = scalar_lea.hbm %s1570_s3, %s961_s18  ;;  %s1525_s24 = int_to_ptr.vmem [resolvable:$true] %s809_s24 }
  0x72   : > { %344 = vmatprep.subr.bf16.mxu0 %v1092_v9  ;;  %385 = vmatprep.subr.bf16.mxu1 %v1094_v10  ;;  %v1105_v20 = vld [vmem:[#allocation7 + $0xc0] sm:$0xff]   ;;  %v1109_v24 = vld [vmem:[#allocation7 + $0xc8] sm:$0xff]   ;;  %v1114_v29 = vld [vmem:[#allocation7 + $0x10] sm:$0xff]   ;;  %v242_v56 = vsub.s32 0, %v241_v52  ;;  %s796_s16 = scalar_lea.sflag [#allocation4], %s1500_s21  ;;  %s1230_s4 = scalar_lea.vmem %s1525_s24, 128 }
  0x73   : > { %v1106_v21 = vld [vmem:[#allocation7] sm:$0xff]   ;;  %v1110_v25 = vld [vmem:[#allocation7 + $0x8] sm:$0xff]   ;;  %v1115_v30 = vld [vmem:[#allocation7 + $0x90] sm:$0xff]   ;;  %p1231_p11 = scmp.ne.s32.totalorder %s1525_s24, %s1230_s4  ;;  %p1584_p0 = scmp.ne.s32.totalorder %s1579_s10, 0 }
  0x74   : > { %v1107_v22 = vld [vmem:[#allocation7 + $0x80] sm:$0xff]   ;;  %v1111_v26 = vld [vmem:[#allocation7 + $0x88] sm:$0xff]   ;;  %v1117_v32 = vld [vmem:[#allocation7 + $0xd8] sm:$0xff]   ;;  %s1310_s5 = smov [#allocation8]  }
  0x75   : > { %345 = vmatpush1.bf16.msra.mxu0 %v1096_v11  ;;  %386 = vmatpush1.bf16.msra.mxu1 %v1097_v12  ;;  %v1118_v33 = vld [vmem:[#allocation7 + $0x18] sm:$0xff]   ;;  %v1120_v35 = vld [vmem:[#allocation7 + $0x60] sm:$0xff]   ;;  %v1124_v39 = vld [vmem:[#allocation7 + $0x68] sm:$0xff]   ;;  %p1232_p1 = pnand %p1231_p11, %p1584_p0  ;;  %s1234_s7 = sshll.u32 %s1310_s5, 4  ;;  %s1235_s7 = int_to_ptr.vmem [resolvable:$false] %s1234_s7 }
  0x76   : > { %346 = vmatprep.subr.bf16.mxu0 %v1098_v13  ;;  %387 = vmatprep.subr.bf16.mxu1 %v1100_v14  ;;  %v1119_v34 = vld [vmem:[#allocation7 + $0x98] sm:$0xff]   ;;  %v1121_v36 = vld [vmem:[#allocation7 + $0xe0] sm:$0xff]   ;;  %v1125_v40 = vld [vmem:[#allocation7 + $0xe8] sm:$0xff]   ;;  %s1236_s8 = scalar_lea.vmem %s1235_s7, 256  ;;  %p1237_p5 = scmp.lt.s32.totalorder %s1525_s24, %s1235_s7 }
  0x77   : > { %v1122_v37 = vld [vmem:[#allocation7 + $0x20] sm:$0xff]   ;;  %v1126_v41 = vld [vmem:[#allocation7 + $0x28] sm:$0xff]   ;;  %v1128_v43 = vld [vmem:[#allocation7 + $0x70] sm:$0xff]   ;;  %p1233_p3 = pneg %p1232_p1  ;;  %p1238_p9 = scmp.lt.s32.totalorder %s1236_s8, %s1230_s4 }
  0x78   : > { %v1123_v38 = vld [vmem:[#allocation7 + $0xa0] sm:$0xff]   ;;  %v1127_v42 = vld [vmem:[#allocation7 + $0xa8] sm:$0xff]   ;;  %v1129_v44 = vld [vmem:[#allocation7 + $0xf0] sm:$0xff]  }
  0x79   : > { %347 = vmatpush1.bf16.msra.mxu0 %v1102_v15  ;;  %388 = vmatpush1.bf16.msra.mxu1 %v1103_v16  ;;  %v1130_v45 = vld [vmem:[#allocation7 + $0x30] sm:$0xff]   ;;  %v1132_v47 = vld [vmem:[#allocation7 + $0x78] sm:$0xff]   ;;  %p1239_p12 = por %p1238_p9, %p1237_p5 }
  0x7a   : > { %964 = vmatprep.subr.bf16.mxu0 %v1104_v19  ;;  %986 = vmatprep.subr.bf16.mxu1 %v1105_v20  ;;  %v1131_v46 = vld [vmem:[#allocation7 + $0xb0] sm:$0xff]   ;;  %v1133_v48 = vld [vmem:[#allocation7 + $0xf8] sm:$0xff]  }
  0x7b   : > { %v1134_v49 = vld [vmem:[#allocation7 + $0x38] sm:$0xff]   ;;  %v232_v53 = vld [vmem:[#allocation5 + $0x80] sm:$0x11]  ;;  %p1240_p2 = pnand %p1239_p12, %p1233_p3 }
  0x7c   : > { %926 = vmatmul.mubr.msk.bf16.vlgmr.msra.gmra.mrb[0].mxu0 %vm336_vm0, %v239_v18  ;;  %927 = vmatmul.mubr.msk.bf16.vlgmr.msra.gmra.mrb[0].mxu1 %vm336_vm0, %v239_v18  ;;  %v1135_v50 = vld [vmem:[#allocation7 + $0xb8] sm:$0xff]   ;;  %v234_v55 = vunpack.c.l.bf16 %v232_v53  ;;  %v235_v58 = vunpack.c.h.bf16 %v232_v53 }
  0x7d   : > { %965 = vmatpush3.bf16.msra.mxu0 %v1106_v21  ;;  %987 = vmatpush3.bf16.msra.mxu1 %v1107_v22  ;;  %v233_v54 = vld [vmem:[#allocation5 + $0x88] sm:$0x11] }
  0x7e   : > { %966 = vmatprep.subr.bf16.mxu0 %v1108_v23  ;;  %988 = vmatprep.subr.bf16.mxu1 %v1109_v24  ;;  %v236_v57 = vunpack.c.l.bf16 %v233_v54  ;;  %v237_v59 = vunpack.c.h.bf16 %v233_v54  ;;  %v243_v60 = vrot.slane %v234_v55, %v242_v56  ;;  %v247_v62 = vrot.slane %v235_v58, %v242_v56 }
  0x80   : > { %v251_v61 = vrot.slane %v236_v57, %v242_v56  ;;  %v255_v63 = vrot.slane %v237_v59, %v242_v56 }
  0x81   : > { %967 = vmatpush3.bf16.msra.mxu0 %v1110_v25  ;;  %989 = vmatpush3.bf16.msra.mxu1 %v1111_v26 }
  0x82   : > { %968 = vmatprep.subr.bf16.mxu0 %v1112_v27  ;;  %990 = vmatprep.subr.bf16.mxu1 %v1113_v28 }
  0x85   : > { %969 = vmatpush3.bf16.msra.mxu0 %v1114_v29  ;;  %991 = vmatpush3.bf16.msra.mxu1 %v1115_v30 }
  0x86   : > { %970 = vmatprep.subr.bf16.mxu0 %v1116_v31  ;;  %992 = vmatprep.subr.bf16.mxu1 %v1117_v32 }
  0x89   : > { %971 = vmatpush3.bf16.msra.mxu0 %v1118_v33  ;;  %993 = vmatpush3.bf16.msra.mxu1 %v1119_v34 }
  0x8a   : > { %972 = vmatprep.subr.bf16.mxu0 %v1120_v35  ;;  %994 = vmatprep.subr.bf16.mxu1 %v1121_v36 }
  0x8d   : > { %973 = vmatpush3.bf16.msra.mxu0 %v1122_v37  ;;  %995 = vmatpush3.bf16.msra.mxu1 %v1123_v38 }
  0x8e   : > { %974 = vmatprep.subr.bf16.mxu0 %v1124_v39  ;;  %996 = vmatprep.subr.bf16.mxu1 %v1125_v40 }
  0x91   : > { %975 = vmatpush3.bf16.msra.mxu0 %v1126_v41  ;;  %997 = vmatpush3.bf16.msra.mxu1 %v1127_v42 }
  0x92   : > { %976 = vmatprep.subr.bf16.mxu0 %v1128_v43  ;;  %998 = vmatprep.subr.bf16.mxu1 %v1129_v44 }
  0x95   : > { %977 = vmatpush3.bf16.msra.mxu0 %v1130_v45  ;;  %999 = vmatpush3.bf16.msra.mxu1 %v1131_v46 }
  0x96   : > { %978 = vmatprep.subr.bf16.mxu0 %v1132_v47  ;;  %1000 = vmatprep.subr.bf16.mxu1 %v1133_v48 }
  0x99   : > { %979 = vmatpush3.bf16.msra.mxu0 %v1134_v49  ;;  %1001 = vmatpush3.bf16.msra.mxu1 %v1135_v50 }
 0x14f   : > { %v374_v0 = vpop.f32.mrb[0].mxu0  ;;  %v415_v1 = vpop.f32.mrb[0].mxu1 }
 0x150   : > { %v375_v2 = vadd.f32 %v374_v0, %v243_v60  ;;  %v416_v3 = vadd.f32 %v415_v1, %v251_v61  ;;  %v376_v4 = vpop.f32.mrb[1].mxu0  ;;  %v417_v5 = vpop.f32.mrb[1].mxu1 }
 0x151   : > { %v377_v6 = vadd.f32 %v376_v4, %v247_v62  ;;  %v418_v7 = vadd.f32 %v417_v5, %v255_v63  ;;  %v378_v8 = vpop.f32.mrb[2].mxu0  ;;  %v419_v9 = vpop.f32.mrb[2].mxu1 }
 0x152   : > { %v422_v10 = vmul.f32 %v375_v2, %v375_v2  ;;  %v424_v11 = vmul.f32 %v416_v3, %v416_v3  ;;  %v379_v12 = vpop.f32.mrb[3].mxu0  ;;  %v420_v13 = vpop.f32.mrb[3].mxu1 }
 0x153   : > { %v423_v14 = vmul.f32 %v377_v6, %v377_v6  ;;  %v425_v15 = vmul.f32 %v418_v7, %v418_v7 }
 0x154   : > { %v426_v16 = vadd.f32 %v424_v11, %v422_v10 }
 0x155   : > { %v427_v17 = vadd.f32 %v425_v15, %v423_v14 }
 0x156   : > { %1136 = vrsqrt.f32 %v426_v16  ;;  %vm430_vm1 = vcmp.eq.f32.partialorder %v426_v16, inf  ;;  %v433_v21 = vand.u32 2147483648, %v426_v16  ;;  %vm432_vm2 = vcmp.eq.f32.partialorder %v426_v16, 0.0 }
 0x157   : > { %1138 = vrsqrt.f32 %v427_v17  ;;  %vm437_vm3 = vcmp.eq.f32.partialorder %v427_v17, inf  ;;  %v440_v24 = vand.u32 2147483648, %v427_v17  ;;  %vm439_vm4 = vcmp.eq.f32.partialorder %v427_v17, 0.0 }
 0x160   : > { %v1137_v18 = vpop.eup %1136 }
 0x161   : > { %v1139_v19 = vpop.eup %1138  ;;  %v429_v20 = vmul.f32 %v1137_v18, %v426_v16 }
 0x162   : > { %v436_v22 = vmul.f32 %v1139_v19, %v427_v17 }
 0x163   : > { %v431_v23 = vsel %vm430_vm1, %v426_v16, %v429_v20 }
 0x164   : > { %v434_v25 = vsel %vm432_vm2, %v433_v21, %v431_v23  ;;  %v438_v26 = vsel %vm437_vm3, %v427_v17, %v436_v22 }
 0x165   : > { %v444_v27 = vmax.f32 %v434_v25, 1e-12  ;;  %v441_v28 = vsel %vm439_vm4, %v440_v24, %v438_v26  ;;  %v442_v30 = vmax.f32 %v434_v25, 1e-08 }
 0x166   : > { %v445_v29 = vmax.f32 %v441_v28, 1e-12  ;;  %v443_v32 = vmax.f32 %v441_v28, 1e-08 }
 0x167   : > { %1140 = vrcp.f32 %v444_v27 }
 0x168   : > { %1142 = vrcp.f32 %v445_v29 }
 0x171   : > { %v1141_v31 = vpop.eup %1140 }
 0x172   : > { %v1143_v33 = vpop.eup %1142  ;;  %v448_v34 = vmul.f32 %v1141_v31, %v442_v30 }
 0x173   : > { %v449_v35 = vmul.f32 %v1143_v33, %v443_v32 }
 0x174   : > { %v450_v36 = vmul.f32 %v448_v34, %v375_v2  ;;  %v452_v37 = vmul.f32 %v448_v34, %v416_v3 }
 0x175   : > { %v453_v38 = vmul.f32 %v449_v35, %v418_v7  ;;  %v451_v39 = vmul.f32 %v449_v35, %v377_v6 }
 0x176   : > { %v454_v42 = vpack.c.bf16 %v450_v36, %v450_v36  ;;  %v456_v43 = vpack.c.bf16 %v452_v37, %v452_v37 }
 0x177   : > { %v457_v40 = vpack.c.bf16 %v453_v38, %v453_v38  ;;  %v455_v41 = vpack.c.bf16 %v451_v39, %v451_v39 }
 0x179   : > { %746 = vmatprep.mubr.bf16.mxu0 %v455_v41  ;;  %786 = vmatprep.mubr.bf16.mxu1 %v457_v40 }
 0x17a   : > { %747 = vmatmul.mubr.bf16.vlgmr.msra.gmra.mrb[4].mxu0 %v454_v42  ;;  %787 = vmatmul.mubr.bf16.vlgmr.msra.gmra.mrb[4].mxu1 %v456_v43 }
 0x24d   : > { %v980_v44 = vpop.f32.mrb[4].mxu0  ;;  %v1002_v45 = vpop.f32.mrb[4].mxu1 }
 0x24e   : > { %v981_v46 = vpop.f32.mrb[5].mxu0  ;;  %v1003_v47 = vpop.f32.mrb[5].mxu1 }
 0x24f   : > { %v982_v48 = vadd.f32 %v981_v46, %v980_v44  ;;  %v1004_v49 = vadd.f32 %v1003_v47, %v1002_v45  ;;  %v983_v50 = vpop.f32.mrb[6].mxu0  ;;  %v1005_v51 = vpop.f32.mrb[6].mxu1 }
 0x250   : > { %v984_v52 = vpop.f32.mrb[7].mxu0  ;;  %v1006_v53 = vpop.f32.mrb[7].mxu1 }
 0x251   : > { %v789_v54 = vadd.f32 %v1004_v49, %v982_v48 }
 0x253   : > { %794 = vst [vmem:[%s214_s20] sm:$0xff] %v789_v54 }
 0x254   : > { %1243 = shalt.err (!%p1240_p2)
}
 0x255   : > { %s1244_s23 = scalar_lea.hbm %s1523_s22, 128  ;;  %s1248_s17 = scalar_lea.hbm %s1570_s3, 256 }
 0x256   : > { %p1245_p13 = scmp.ne.s32.totalorder %s1523_s22, %s1244_s23  ;;  %p1249_p4 = scmp.lt.u32.totalorder %s1523_s22, %s1570_s3 }
 0x257   : > { %p1250_p7 = scmp.lt.u32.totalorder %s1248_s17, %s1244_s23  ;;  %p1252_p11 = scmp.lt.u32.totalorder %s1244_s23, %s1523_s22 }
 0x258   : > { %p1246_p6 = pnand %p1245_p13, %p1584_p0 }
 0x259   : > { %p1251_p8 = por %p1250_p7, %p1249_p4 }
 0x25a   : > { %p1247_p10 = pneg %p1246_p6 }
 0x25b   : > { %p1253_p1 = por %p1252_p11, %p1251_p8 }
 0x25d   : > { %p1254_p3 = pnand %p1253_p1, %p1247_p10 }
 0x25f   : > { %1257 = shalt.err (!%p1254_p3)
}
 0x260   : > { %1018 = dma.vmem_to_hbm [thread:$0]  (%p1584_p0), %s1525_s24, 128, %s1523_s22, %s796_s16  }
 0x261 PF: > { %s821_s29 = sand.u32 1, %s1288_s12   ;;  %p1585_p5 = scmp.ne.s32.totalorder %s1575_s19, 0 }
 0x262   : > { %p1586_p9 = scmp.ge.s32.totalorder %s1300_s15, 2  ;;  %s822_s30 = scalar_lea.sflag [#allocation4], %s821_s29 }
 0x264   : > { %p1032_p12 = pnand %p1586_p9, %p1585_p5 }
 0x266   : > { %1283 = dma.done.wait (!%p1032_p12), %s822_s30, 128  }
 0x267   : > { %1285 = vsyncadd (!%p1032_p12), %s822_s30, 4294967168  ;;  %p17_p2 = scmp.ge.s32.totalorder %s1441_s6, 4   ;;  %s1587_s12 = smov %s1292_s13 }
 0x268   : > { %s1588_s13 = smov %s1296_s14  ;;  %s1589_s14 = smov %s1450_s9 }
 0x269   : > { %s1590_s15 = smov %s1441_s6  ;;  %19 = sbr.rel (!%p17_p2) target bundleno = 6 (0x6), region = 85 }
 0x270   :  { %827 = vsyncpa [#allocation3], 1 }
 0x271   :  { %829 = vsyncpa [#allocation3 + $0x1], 1 }
 0x272   :  { %830 = vsyncpa [#allocation6], 1 }
 0x273   :  { %831 = vsyncpa [#allocation4], 1 }
 0x274   :  { %833 = vsyncpa [#allocation4 + $0x1], 1 }

</bundles_post_ra>
